<compile_context>
chip_gen: v7x
topology: tpu7x:2x2x1
jax: 0.10.0
libtpu: 0.0.40
codegen_flags: <defaults>
</compile_context>

<pallas_src>
import math

import jax
import jax.numpy as jnp
from jax import lax
from jax.experimental import pallas as pl
from jax.experimental.pallas import tpu as pltpu

_MiB = 1 << 20


def _gelu_tanh(x):
    # Exactly the paper/BERT tanh-approximation used by the PyTorch GELU module.
    c = math.sqrt(2.0 / math.pi)
    return 0.5 * x * (1.0 + jnp.tanh(c * (x + 0.044715 * x * x * x)))


def _tpu_generation():
    try:
        kind = jax.devices()[0].device_kind.lower()
    except Exception:
        return None
    for g in ("v5", "v6", "v7"):
        if g in kind:
            return g
    return None


_GEN_CFG = {
    # v5e: 128 MiB VMEM, compute-bound -> big tiles, high vmem limit, residency is cheap.
    "v5": dict(tl_cand=(2048, 1024, 512, 256, 128, 64, 32, 16, 8),
               tf_cand=(1024, 512, 256, 128),
               resident_budget=80 * _MiB, vmem_cap=104 * _MiB),
    # v6e: weight-bandwidth-bound -> keep both weight matrices resident when they fit.
    "v6": dict(tl_cand=(1024, 512, 256, 128, 64, 32, 16, 8),
               tf_cand=(512, 256, 128),
               resident_budget=64 * _MiB, vmem_cap=100 * _MiB),
    # v7x: only 64 MiB physical VMEM per TC -> bias toward larger TL, leave headroom.
    "v7": dict(tl_cand=(1024, 512, 256, 128, 64, 32, 16, 8),
               tf_cand=(512, 256, 128),
               resident_budget=24 * _MiB, vmem_cap=52 * _MiB),
    # Unknown generation -> conservative (v7x-like) settings.
    None: dict(tl_cand=(512, 256, 128, 64, 32, 16, 8),
               tf_cand=(512, 256, 128),
               resident_budget=24 * _MiB, vmem_cap=52 * _MiB),
}


def _pick_tl(L, B, cfg):
    divs = [c for c in cfg["tl_cand"] if L % c == 0]
    if B == 1:  # keep B * n_t >= 2 so both TensorCores get work
        two = [c for c in divs if L // c >= 2]
        if two:
            return two[0]
    return divs[0] if divs else L


def _pick_tf(Dff, Dm, cfg):
    # Whole-weight residency: w1 + w2, bf16, double buffered.
    if 2 * 2 * Dm * Dff * 2 <= cfg["resident_budget"]:
        return Dff
    for c in cfg["tf_cand"]:
        if Dff % c == 0:
            return c
    return Dff


def _vmem_estimate(TL, TF, Dm, use_dwconv, weight_bufs):
    n = 0
    n += 2 * TL * Dm * 2                          # x tile (bf16), double buffered
    n += 2 * TL * Dm * 4                          # output tile (f32), double buffered
    n += TL * Dm * 4                              # f32 accumulator scratch
    n += weight_bufs * (Dm * TF + TF * Dm) * 2    # w1 / w2 bf16 tiles
    n += 2 * (TF * 4 + Dm * 4)                    # b1 / b2
    if use_dwconv:
        n += 2 * 2 * TF * 4                       # halo-h tile
        n += 2 * (3 * TF + TF) * 4                # dwk / dwb
    return n


def _ffn_body(x_ref, hb_ref, w1_ref, b1_ref, dwk_ref, dwb_ref, w2_ref, b2_ref,
              o_ref, acc_ref, *, TL, use_dwconv):
    f = pl.program_id(2)

    @pl.when(f == 0)
    def _():
        # Fold b2 into the accumulator init (saves one (TL, Dm) add at finalize).
        acc_ref[...] = jnp.broadcast_to(b2_ref[...], acc_ref.shape)

    # ---- w_1: (TL, Dm) @ (Dm, TF) on the MXU, f32 accumulation; bias in f32 ----
    h = jnp.dot(x_ref[0], w1_ref[...], preferred_element_type=jnp.float32) + b1_ref[...]

    if use_dwconv:
        # Depthwise Conv1d(k=3, stride=1, pad=1, groups=d_ff) along the sequence, fused with
        # the residual: (1 + k1)*h[l] + k0*h[l-1] + k2*h[l+1] + dwb.  Tile-edge neighbors
        # come from the precomputed halo rows of h (row 0: h just above the tile, row 1:
        # h just below; already zeroed at the global sequence edges by the wrapper).
        hb = hb_ref[0, 0]                                     # (2, TF) f32
        row = lax.broadcasted_iota(jnp.int32, h.shape, 0)
        h_up = pltpu.roll(h, shift=1, axis=0)                 # h[l-1] (wraps at row 0)
        h_up = jnp.where(row == 0, hb[0:1, :], h_up)          # fix row 0 from the halo
        h_dn = pltpu.roll(h, shift=TL - 1, axis=0)            # h[l+1] (wraps at last row)
        h_dn = jnp.where(row == TL - 1, hb[1:2, :], h_dn)     # fix last row from the halo
        k = dwk_ref[...]                                      # (3, TF)
        h = ((1.0 + k[1:2, :]) * h
             + k[0:1, :] * h_up
             + k[2:3, :] * h_dn
             + dwb_ref[...])

    # TODO(synk): nn.Dropout is treated as identity (inference/eval semantics); training
    # would need pltpu.prng_seed / prng_random_bits based dropout.
    a = _gelu_tanh(h)

    # ---- w_2: accumulate (TL, TF) @ (TF, Dm) into the f32 scratch ----
    acc_ref[...] += jnp.dot(a.astype(jnp.bfloat16), w2_ref[...],
                            preferred_element_type=jnp.float32)

    @pl.when(f == pl.num_programs(2) - 1)
    def _():
        o_ref[0] = acc_ref[...].astype(o_ref.dtype)


def _make_kernel(TL, use_dwconv):
    if use_dwconv:
        def kernel(x_ref, hb_ref, w1_ref, b1_ref, dwk_ref, dwb_ref, w2_ref, b2_ref,
                   o_ref, acc_ref):
            _ffn_body(x_ref, hb_ref, w1_ref, b1_ref, dwk_ref, dwb_ref, w2_ref, b2_ref,
                      o_ref, acc_ref, TL=TL, use_dwconv=True)
    else:
        def kernel(x_ref, w1_ref, b1_ref, w2_ref, b2_ref, o_ref, acc_ref):
            _ffn_body(x_ref, None, w1_ref, b1_ref, None, None, w2_ref, b2_ref,
                      o_ref, acc_ref, TL=TL, use_dwconv=False)
    return kernel


def positionwise_ffn(x, params, mlp_ds="DS", tl=None, tf=None):
    """x: (B, L, d_model) float32. Returns (B, L, d_model) float32."""
    B, L, Dm = x.shape
    Dff = params["w1"].shape[1]
    use_dwconv = (mlp_ds == "DS")

    cfg = _GEN_CFG.get(_tpu_generation(), _GEN_CFG[None])
    TL = tl if tl is not None else _pick_tl(L, B, cfg)
    TF = tf if tf is not None else _pick_tf(Dff, Dm, cfg)
    assert L % TL == 0 and Dff % TF == 0
    assert TL == L or TL % 8 == 0, "TL must be 8-aligned (sublane) or the full sequence"
    assert TF == Dff or TF % 128 == 0, "TF must be 128-aligned (lane) or the full d_ff"
    n_t, n_f = L // TL, Dff // TF

    # bf16 activations / weights at the call boundary (MXU-native, halves DMA bytes);
    # biases, conv taps, GELU and accumulation stay f32.
    x_bf = x.astype(jnp.bfloat16)
    w1 = params["w1"].astype(jnp.bfloat16)
    w2 = params["w2"].astype(jnp.bfloat16)

    inputs = [x_bf]
    in_specs = [pl.BlockSpec((1, TL, Dm), lambda b, t, f: (b, t, 0))]

    if use_dwconv:
        # Precompute the halo rows of h = x@W1 + b1 (one row on each side of every L tile)
        # with two row gathers (no full padded copy of x).
        starts = jnp.arange(n_t) * TL
        prev_x = jnp.take(x_bf, jnp.maximum(starts - 1, 0), axis=1)      # (B, n_t, Dm)
        next_x = jnp.take(x_bf, jnp.minimum(starts + TL, L - 1), axis=1)  # (B, n_t, Dm)
        boundary = jnp.stack([prev_x, next_x], axis=2)                    # (B, n_t, 2, Dm)
        hb = jnp.einsum("btrd,df->btrf", boundary, w1,
                        preferred_element_type=jnp.float32) + params["b1"][0]
        # The conv zero-pads h, so out-of-range halo rows must be exactly 0 (not b1).
        hb = hb.at[:, 0, 0, :].set(0.0)
        hb = hb.at[:, n_t - 1, 1, :].set(0.0)
        inputs.append(hb)
        in_specs.append(pl.BlockSpec((1, 1, 2, TF), lambda b, t, f: (b, t, 0, f)))

    # Weight tiles: triple-buffer only when TL is small (per-step weight DMA not hidden by
    # compute) and there are enough f steps for the extra buffer to matter.
    wkw = dict(pipeline_mode=pl.Buffered(3)) if (TL <= 128 and n_f >= 3) else {}
    weight_bufs = 3 if wkw else 2

    inputs += [w1, params["b1"]]
    in_specs += [pl.BlockSpec((Dm, TF), lambda b, t, f: (0, f), **wkw),
                 pl.BlockSpec((1, TF), lambda b, t, f: (0, f))]
    if use_dwconv:
        inputs += [params["dwk"], params["dwb"]]
        in_specs += [pl.BlockSpec((3, TF), lambda b, t, f: (0, f)),
                     pl.BlockSpec((1, TF), lambda b, t, f: (0, f))]
    inputs += [w2, params["b2"]]
    in_specs += [pl.BlockSpec((TF, Dm), lambda b, t, f: (f, 0), **wkw),
                 pl.BlockSpec((1, Dm), lambda b, t, f: (0, 0))]

    vmem_limit = min(cfg["vmem_cap"],
                     max(32 * _MiB,
                         int(1.25 * _vmem_estimate(TL, TF, Dm, use_dwconv, weight_bufs))
                         + 4 * _MiB))

    grid_spec = pltpu.PrefetchScalarGridSpec(
        num_scalar_prefetch=0,
        grid=(B, n_t, n_f),
        in_specs=in_specs,
        out_specs=pl.BlockSpec((1, TL, Dm), lambda b, t, f: (b, t, 0)),
        scratch_shapes=[pltpu.VMEM((TL, Dm), jnp.float32)],
    )

    return pl.pallas_call(
        _make_kernel(TL, use_dwconv),
        out_shape=jax.ShapeDtypeStruct((B, L, Dm), jnp.float32),
        grid_spec=grid_spec,
        compiler_params=pltpu.CompilerParams(
            dimension_semantics=("parallel", "parallel", "arbitrary"),
            vmem_limit_bytes=vmem_limit,
        ),
    )(*inputs)


def _reference(x, params, mlp_ds="DS", bf16_matmul=True):
    # Pure-JAX reference mirroring the PyTorch forward (dropout = identity).
    cast = (lambda a: a.astype(jnp.bfloat16)) if bf16_matmul else (lambda a: a)
    h = jnp.dot(cast(x), cast(params["w1"]),
                preferred_element_type=jnp.float32) + params["b1"]
    if mlp_ds == "DS":
        h_up = jnp.pad(h, ((0, 0), (1, 0), (0, 0)))[:, :-1, :]
        h_dn = jnp.pad(h, ((0, 0), (0, 1), (0, 0)))[:, 1:, :]
        h = ((1.0 + params["dwk"][1]) * h + params["dwk"][0] * h_up
             + params["dwk"][2] * h_dn + params["dwb"])
    a = _gelu_tanh(h)
    return jnp.dot(cast(a), cast(params["w2"]),
                   preferred_element_type=jnp.float32) + params["b2"]


def _init_params(key, d_model, d_ff):
    ks = jax.random.split(key, 6)
    lim1 = 1.0 / math.sqrt(d_model)
    lim2 = 1.0 / math.sqrt(d_ff)
    lim_dw = 1.0 / math.sqrt(1 * 3)  # groups=d_ff -> fan_in = in_ch/groups * k = 3
    return {
        # nn.Linear(d_model, d_ff): weight (d_ff, d_model), stored transposed.
        "w1": jax.random.uniform(ks[0], (d_model, d_ff), jnp.float32, -lim1, lim1),
        "b1": jax.random.uniform(ks[1], (1, d_ff), jnp.float32, -lim1, lim1),
        # nn.Conv1d(d_ff, d_ff, 3, groups=d_ff): weight (d_ff, 1, 3) -> taps (3, d_ff).
        "dwk": jax.random.uniform(ks[2], (3, d_ff), jnp.float32, -lim_dw, lim_dw),
        "dwb": jax.random.uniform(ks[3], (1, d_ff), jnp.float32, -lim_dw, lim_dw),
        # nn.Linear(d_ff, d_model): weight (d_model, d_ff), stored transposed.
        "w2": jax.random.uniform(ks[4], (d_ff, d_model), jnp.float32, -lim2, lim2),
        "b2": jax.random.uniform(ks[5], (1, d_model), jnp.float32, -lim2, lim2),
    }


if __name__ == "__main__":
    # Small but lane-dense shapes; tl=16 / tf=128 force multiple L tiles (halo path) and
    # multiple d_ff tiles (accumulator path) so both are exercised.
    B, L, d_model, d_ff = 2, 32, 128, 256
    key = jax.random.PRNGKey(0)
    kx, kp = jax.random.split(key)
    x = jax.random.normal(kx, (B, L, d_model), dtype=jnp.float32)
    params = _init_params(kp, d_model, d_ff)

    # DS path (Linear -> +DWConv residual -> GELU -> Linear)
    out_ds = jax.block_until_ready(positionwise_ffn(x, params, mlp_ds="DS", tl=16, tf=128))
    assert out_ds.shape == (B, L, d_model)
    ref_bf = _reference(x, params, mlp_ds="DS", bf16_matmul=True)
    ref_f32 = _reference(x, params, mlp_ds="DS", bf16_matmul=False)
    assert jnp.allclose(out_ds, ref_bf, atol=2e-2, rtol=2e-2)
    assert jnp.allclose(out_ds, ref_f32, atol=5e-2, rtol=5e-2)

    # Plain path (Linear -> GELU -> Linear), no boundary/dwconv operands at all.
    out_plain = jax.block_until_ready(positionwise_ffn(x, params, mlp_ds=None, tl=16, tf=128))
    ref_plain = _reference(x, params, mlp_ds=None, bf16_matmul=True)
    assert jnp.allclose(out_plain, ref_plain, atol=2e-2, rtol=2e-2)

    # Default (generation-aware) tiling path, no explicit tl/tf.
    out_auto = jax.block_until_ready(positionwise_ffn(x, params, mlp_ds="DS"))
    assert jnp.allclose(out_auto, ref_bf, atol=2e-2, rtol=2e-2)

    print("KERNEL_OK")
</pallas_src>

<mosaic_0001>
module attributes {stable_mosaic.version = 11 : i64} {
  func.func @kernel(%arg0: i32, %arg1: i32, %arg2: i32, %arg3: memref<1x16x128xbf16, #tpu.memory_space<vmem>>, %arg4: memref<1x1x2x128xf32, #tpu.memory_space<vmem>>, %arg5: memref<128x128xbf16, #tpu.memory_space<vmem>>, %arg6: memref<1x128xf32, #tpu.memory_space<vmem>>, %arg7: memref<3x128xf32, #tpu.memory_space<vmem>>, %arg8: memref<1x128xf32, #tpu.memory_space<vmem>>, %arg9: memref<128x128xbf16, #tpu.memory_space<vmem>>, %arg10: memref<1x128xf32, #tpu.memory_space<vmem>>, %arg11: memref<1x16x128xf32, #tpu.memory_space<vmem>>, %arg12: memref<16x128xf32, #tpu.memory_space<vmem>>) attributes {dimension_semantics = [#tpu.dimension_semantics<parallel>, #tpu.dimension_semantics<parallel>, #tpu.dimension_semantics<arbitrary>], iteration_bounds = array<i64: 2, 2, 2>, scalar_prefetch = 0 : i64, scratch_operands = 1 : i64, tpu.core_type = #tpu.core_type<tc>, window_params = [{transform_indices = @transform_0, window_bounds = array<i64: 1, 16, 128>}, {transform_indices = @transform_1, window_bounds = array<i64: 1, 1, 2, 128>}, {transform_indices = @transform_2, window_bounds = array<i64: 128, 128>}, {transform_indices = @transform_3, window_bounds = array<i64: 1, 128>}, {transform_indices = @transform_4, window_bounds = array<i64: 3, 128>}, {transform_indices = @transform_5, window_bounds = array<i64: 1, 128>}, {transform_indices = @transform_6, window_bounds = array<i64: 128, 128>}, {pipeline_mode = #tpu.pipeline_mode<synchronous>, transform_indices = @transform_7, window_bounds = array<i64: 1, 128>}, {transform_indices = @transform_8, window_bounds = array<i64: 1, 16, 128>}]} {
    %c0_i32 = arith.constant 0 : i32
    %0 = arith.cmpi eq, %arg2, %c0_i32 : i32
    %1 = arith.extui %0 : i1 to i32
    %c0_i32_0 = arith.constant 0 : i32
    %2 = arith.cmpi ne, %1, %c0_i32_0 : i32
    scf.if %2 {
      %c0_31 = arith.constant 0 : index
      %c0_32 = arith.constant 0 : index
      %66 = vector.load %arg10[%c0_31, %c0_32] : memref<1x128xf32, #tpu.memory_space<vmem>>, vector<1x128xf32>
      %67 = vector.shape_cast %66 : vector<1x128xf32> to vector<1x128xf32>
      %68 = vector.broadcast %67 : vector<1x128xf32> to vector<16x128xf32>
      %c0_33 = arith.constant 0 : index
      %c0_34 = arith.constant 0 : index
      %69 = vector.load %arg12[%c0_33, %c0_34] : memref<16x128xf32, #tpu.memory_space<vmem>>, vector<16x128xf32>
      tpu.vector_store %arg12[%c0_33, %c0_34], %68 {strides = array<i32>} : memref<16x128xf32, #tpu.memory_space<vmem>>, vector<16x128xf32>,
    } else {
    }
    %c0 = arith.constant 0 : index
    %c0_1 = arith.constant 0 : index
    %c0_2 = arith.constant 0 : index
    %3 = vector.load %arg3[%c0, %c0_1, %c0_2] : memref<1x16x128xbf16, #tpu.memory_space<vmem>>, vector<1x16x128xbf16>
    %4 = vector.shape_cast %3 : vector<1x16x128xbf16> to vector<16x128xbf16>
    %c0_3 = arith.constant 0 : index
    %c0_4 = arith.constant 0 : index
    %5 = vector.load %arg5[%c0_3, %c0_4] : memref<128x128xbf16, #tpu.memory_space<vmem>>, vector<128x128xbf16>
    %cst = arith.constant dense<0.000000e+00> : vector<16x128xf32>
    %6 = tpu.matmul %4, %5, %cst {dimension_numbers = #tpu.dot_dimension_numbers<[1], [0], [0], [1], [0, 0, 1, 1], [], []>} : vector<16x128xbf16>, vector<128x128xbf16>, vector<16x128xf32> -> vector<16x128xf32>
    %c0_5 = arith.constant 0 : index
    %c0_6 = arith.constant 0 : index
    %7 = vector.load %arg6[%c0_5, %c0_6] : memref<1x128xf32, #tpu.memory_space<vmem>>, vector<1x128xf32>
    %8 = vector.broadcast %7 : vector<1x128xf32> to vector<16x128xf32>
    %9 = arith.addf %6, %8 : vector<16x128xf32>
    %c0_7 = arith.constant 0 : index
    %c0_8 = arith.constant 0 : index
    %c0_9 = arith.constant 0 : index
    %c0_10 = arith.constant 0 : index
    %10 = vector.load %arg4[%c0_7, %c0_8, %c0_9, %c0_10] : memref<1x1x2x128xf32, #tpu.memory_space<vmem>>, vector<1x1x2x128xf32>
    %11 = vector.shape_cast %10 : vector<1x1x2x128xf32> to vector<2x128xf32>
    %12 = tpu.iota {dimensions = array<i32: 0>} : vector<16x128xi32>
    %c1_i32 = arith.constant 1 : i32
    %13 = tpu.dynamic_rotate %9 by %c1_i32 dim 0 : vector<16x128xf32>, i32 -> vector<16x128xf32>
    %c0_i32_11 = arith.constant 0 : i32
    %14 = vector.broadcast %c0_i32_11 : i32 to vector<16x128xi32>
    %15 = arith.cmpi eq, %12, %14 : vector<16x128xi32>
    %16 = vector.extract_strided_slice %11 {offsets = [0, 0], sizes = [1, 128], strides = [1, 1]} : vector<2x128xf32> to vector<1x128xf32>
    %17 = vector.shape_cast %16 : vector<1x128xf32> to vector<1x128xf32>
    %18 = vector.broadcast %17 : vector<1x128xf32> to vector<16x128xf32>
    %19 = arith.select %15, %18, %13 : vector<16x128xi1>, vector<16x128xf32>
    %c15_i32 = arith.constant 15 : i32
    %20 = tpu.dynamic_rotate %9 by %c15_i32 dim 0 : vector<16x128xf32>, i32 -> vector<16x128xf32>
    %c15_i32_12 = arith.constant 15 : i32
    %21 = vector.broadcast %c15_i32_12 : i32 to vector<16x128xi32>
    %22 = arith.cmpi eq, %12, %21 : vector<16x128xi32>
    %23 = vector.extract_strided_slice %11 {offsets = [1, 0], sizes = [1, 128], strides = [1, 1]} : vector<2x128xf32> to vector<1x128xf32>
    %24 = vector.shape_cast %23 : vector<1x128xf32> to vector<1x128xf32>
    %25 = vector.broadcast %24 : vector<1x128xf32> to vector<16x128xf32>
    %26 = arith.select %22, %25, %20 : vector<16x128xi1>, vector<16x128xf32>
    %c0_13 = arith.constant 0 : index
    %c0_14 = arith.constant 0 : index
    %27 = vector.load %arg7[%c0_13, %c0_14] : memref<3x128xf32, #tpu.memory_space<vmem>>, vector<3x128xf32>
    %28 = vector.extract_strided_slice %27 {offsets = [1, 0], sizes = [1, 128], strides = [1, 1]} : vector<3x128xf32> to vector<1x128xf32>
    %cst_15 = arith.constant 1.000000e+00 : f32
    %29 = vector.broadcast %cst_15 : f32 to vector<1x128xf32>
    %30 = arith.addf %29, %28 : vector<1x128xf32>
    %31 = vector.broadcast %30 : vector<1x128xf32> to vector<16x128xf32>
    %32 = arith.mulf %31, %9 : vector<16x128xf32>
    %33 = vector.extract_strided_slice %27 {offsets = [0, 0], sizes = [1, 128], strides = [1, 1]} : vector<3x128xf32> to vector<1x128xf32>
    %34 = vector.broadcast %33 : vector<1x128xf32> to vector<16x128xf32>
    %35 = arith.mulf %34, %19 : vector<16x128xf32>
    %36 = arith.addf %32, %35 : vector<16x128xf32>
    %37 = vector.extract_strided_slice %27 {offsets = [2, 0], sizes = [1, 128], strides = [1, 1]} : vector<3x128xf32> to vector<1x128xf32>
    %38 = vector.broadcast %37 : vector<1x128xf32> to vector<16x128xf32>
    %39 = arith.mulf %38, %26 : vector<16x128xf32>
    %40 = arith.addf %36, %39 : vector<16x128xf32>
    %c0_16 = arith.constant 0 : index
    %c0_17 = arith.constant 0 : index
    %41 = vector.load %arg8[%c0_16, %c0_17] : memref<1x128xf32, #tpu.memory_space<vmem>>, vector<1x128xf32>
    %42 = vector.broadcast %41 : vector<1x128xf32> to vector<16x128xf32>
    %43 = arith.addf %40, %42 : vector<16x128xf32>
    %cst_18 = arith.constant 5.000000e-01 : f32
    %44 = vector.broadcast %cst_18 : f32 to vector<16x128xf32>
    %45 = arith.mulf %44, %43 : vector<16x128xf32>
    %cst_19 = arith.constant 4.471500e-02 : f32
    %46 = vector.broadcast %cst_19 : f32 to vector<16x128xf32>
    %47 = arith.mulf %46, %43 : vector<16x128xf32>
    %48 = arith.mulf %47, %43 : vector<16x128xf32>
    %49 = arith.mulf %48, %43 : vector<16x128xf32>
    %50 = arith.addf %43, %49 : vector<16x128xf32>
    %cst_20 = arith.constant 0.797884583 : f32
    %51 = vector.broadcast %cst_20 : f32 to vector<16x128xf32>
    %52 = arith.mulf %51, %50 : vector<16x128xf32>
    %53 = math.tanh %52 : vector<16x128xf32>
    %cst_21 = arith.constant 1.000000e+00 : f32
    %54 = vector.broadcast %cst_21 : f32 to vector<16x128xf32>
    %55 = arith.addf %54, %53 : vector<16x128xf32>
    %56 = arith.mulf %45, %55 : vector<16x128xf32>
    %c0_22 = arith.constant 0 : index
    %c0_23 = arith.constant 0 : index
    %57 = vector.load %arg12[%c0_22, %c0_23] : memref<16x128xf32, #tpu.memory_space<vmem>>, vector<16x128xf32>
    %58 = arith.truncf %56 : vector<16x128xf32> to vector<16x128xbf16>
    %c0_24 = arith.constant 0 : index
    %c0_25 = arith.constant 0 : index
    %59 = vector.load %arg9[%c0_24, %c0_25] : memref<128x128xbf16, #tpu.memory_space<vmem>>, vector<128x128xbf16>
    %cst_26 = arith.constant dense<0.000000e+00> : vector<16x128xf32>
    %60 = tpu.matmul %58, %59, %cst_26 {dimension_numbers = #tpu.dot_dimension_numbers<[1], [0], [0], [1], [0, 0, 1, 1], [], []>} : vector<16x128xbf16>, vector<128x128xbf16>, vector<16x128xf32> -> vector<16x128xf32>
    %61 = arith.addf %57, %60 : vector<16x128xf32>
    %c0_27 = arith.constant 0 : index
    %c0_28 = arith.constant 0 : index
    %62 = vector.load %arg12[%c0_27, %c0_28] : memref<16x128xf32, #tpu.memory_space<vmem>>, vector<16x128xf32>
    tpu.vector_store %arg12[%c0_27, %c0_28], %61 {strides = array<i32>} : memref<16x128xf32, #tpu.memory_space<vmem>>, vector<16x128xf32>,
    %c1_i32_29 = arith.constant 1 : i32
    %63 = arith.cmpi eq, %arg2, %c1_i32_29 : i32
    %64 = arith.extui %63 : i1 to i32
    %c0_i32_30 = arith.constant 0 : i32
    %65 = arith.cmpi ne, %64, %c0_i32_30 : i32
    scf.if %65 {
      %c0_31 = arith.constant 0 : index
      %c0_32 = arith.constant 0 : index
      %66 = vector.load %arg12[%c0_31, %c0_32] : memref<16x128xf32, #tpu.memory_space<vmem>>, vector<16x128xf32>
      %c0_33 = arith.constant 0 : index
      %c0_34 = arith.constant 0 : index
      %c0_35 = arith.constant 0 : index
      %67 = vector.load %arg11[%c0_33, %c0_34, %c0_35] : memref<1x16x128xf32, #tpu.memory_space<vmem>>, vector<1x16x128xf32>
      %68 = vector.shape_cast %67 : vector<1x16x128xf32> to vector<16x128xf32>
      %69 = vector.shape_cast %66 : vector<16x128xf32> to vector<1x16x128xf32>
      tpu.vector_store %arg11[%c0_33, %c0_34, %c0_35], %69 {strides = array<i32>} : memref<1x16x128xf32, #tpu.memory_space<vmem>>, vector<1x16x128xf32>,
    } else {
    }
    return
  }
  func.func @transform_0(%arg0: i32, %arg1: i32, %arg2: i32) -> (i32, i32, i32) {
    %c0_i32 = arith.constant 0 : i32
    %c0_i32_0 = arith.constant 0 : i32
    return %arg0, %arg1, %c0_i32 : i32, i32, i32
  }
  func.func @transform_1(%arg0: i32, %arg1: i32, %arg2: i32) -> (i32, i32, i32, i32) {
    %c0_i32 = arith.constant 0 : i32
    %c0_i32_0 = arith.constant 0 : i32
    return %arg0, %arg1, %c0_i32, %arg2 : i32, i32, i32, i32
  }
  func.func @transform_2(%arg0: i32, %arg1: i32, %arg2: i32) -> (i32, i32) {
    %c0_i32 = arith.constant 0 : i32
    %c0_i32_0 = arith.constant 0 : i32
    return %c0_i32, %arg2 : i32, i32
  }
  func.func @transform_3(%arg0: i32, %arg1: i32, %arg2: i32) -> (i32, i32) {
    %c0_i32 = arith.constant 0 : i32
    %c0_i32_0 = arith.constant 0 : i32
    return %c0_i32, %arg2 : i32, i32
  }
  func.func @transform_4(%arg0: i32, %arg1: i32, %arg2: i32) -> (i32, i32) {
    %c0_i32 = arith.constant 0 : i32
    %c0_i32_0 = arith.constant 0 : i32
    return %c0_i32, %arg2 : i32, i32
  }
  func.func @transform_5(%arg0: i32, %arg1: i32, %arg2: i32) -> (i32, i32) {
    %c0_i32 = arith.constant 0 : i32
    %c0_i32_0 = arith.constant 0 : i32
    return %c0_i32, %arg2 : i32, i32
  }
  func.func @transform_6(%arg0: i32, %arg1: i32, %arg2: i32) -> (i32, i32) {
    %c0_i32 = arith.constant 0 : i32
    %c0_i32_0 = arith.constant 0 : i32
    return %arg2, %c0_i32 : i32, i32
  }
  func.func @transform_7(%arg0: i32, %arg1: i32, %arg2: i32) -> (i32, i32) {
    %c0_i32 = arith.constant 0 : i32
    %c0_i32_0 = arith.constant 0 : i32
    %c0_i32_1 = arith.constant 0 : i32
    return %c0_i32, %c0_i32_0 : i32, i32
  }
  func.func @transform_8(%arg0: i32, %arg1: i32, %arg2: i32) -> (i32, i32, i32) {
    %c0_i32 = arith.constant 0 : i32
    %c0_i32_0 = arith.constant 0 : i32
    return %arg0, %arg1, %c0_i32 : i32, i32, i32
  }
}

</mosaic_0001>

<bundles_post_ra>
// kernel: tpu_custom_call.1
= control target key start
LH: loop header
LB: loop body
LE: loop exit
PB: predicated region body
PF: predicated region fallthrough
CT: control target
= control target key end

     0   :  { %s2267_s0 = inlined_call_operand.hbm [shape: bf16[2,32,128], index: 0, kind: input, shape index: {}]   ;;  %s2268_s1 = inlined_call_operand.hbm [shape: f32[2,2,2,256], index: 1, kind: input, shape index: {}]   ;;  %s2269_s2 = inlined_call_operand.hbm [shape: bf16[128,256], index: 2, kind: input, shape index: {}]   ;;  %s2270_s3 = inlined_call_operand.vmem [shape: f32[1,256], index: 3, kind: input, shape index: {}]   ;;  %s2271_s4 = inlined_call_operand.vmem [shape: f32[3,256], index: 4, kind: input, shape index: {}]   ;;  %s2272_s5 = inlined_call_operand.vmem [shape: f32[1,256], index: 5, kind: input, shape index: {}]   ;;  %s2273_s6 = inlined_call_operand.hbm [shape: bf16[256,128], index: 6, kind: input, shape index: {}]   ;;  %s2274_s7 = inlined_call_operand.vmem [shape: f32[1,128], index: 7, kind: input, shape index: {}]   ;;  %s2275_s8 = inlined_call_operand.hbm [shape: f32[2,32,128], index: 8, kind: output, shape index: {}]  }
   0x1   :  { %2302 = sst [smem:[#allocation33_spill]] %s2267_s0 }
   0x2   :  { %2303 = sst [smem:[#allocation34_spill]] %s2268_s1 }
   0x3   :  { %2304 = sst [smem:[#allocation35_spill]] %s2269_s2 }
   0x4   :  { %2305 = sst [smem:[#allocation36_spill]] %s2270_s3 }
   0x5   :  { %2306 = sst [smem:[#allocation37_spill]] %s2271_s4 }
   0x6   :  { %2307 = sst [smem:[#allocation38_spill]] %s2272_s5 }
   0x7   :  { %2308 = sst [smem:[#allocation39_spill]] %s2273_s6 }
   0x8   :  { %2309 = sst [smem:[#allocation40_spill]] %s2274_s7 }
   0x9   :  { %2310 = sst [smem:[#allocation41_spill]] %s2275_s8 }
   0xa   :  { %13 = vsyncpa [#allocation4], 0 }
   0xb   :  { %15 = vsyncpa [#allocation4 + $0x1], 0 }
   0xc   :  { %16 = vsyncpa [#allocation7], 0 }
   0xd   :  { %18 = vsyncpa [#allocation7 + $0x1], 0 }
   0xe   :  { %19 = vsyncpa [#allocation10], 0 }
   0xf   :  { %21 = vsyncpa [#allocation10 + $0x1], 0 }
  0x10   :  { %22 = vsyncpa [#allocation5], 0 }
  0x11   :  { %24 = vsyncpa [#allocation5 + $0x1], 0  ;;  %s1714_s27 = smov 0   ;;  %s1716_s28 = smov 0  }
  0x12   :  { %s1718_s29 = smov 0   ;;  %s1720_s30 = smov 0  }
  0x13   :  { %2311 = sst [smem:[#allocation17_spill]] %s1720_s30  ;;  %s1722_s9 = smov 0  }
  0x14   :  { %s1724_s10 = smov 0   ;;  %s1726_s11 = smov 0  }
  0x15   :  { %s1728_s12 = smov 0   ;;  %s1730_s13 = smov 0  }
  0x16   :  { %s1732_s14 = smov 0   ;;  %s1734_s15 = smov 0  }
  0x17   :  { %s1736_s16 = smov 0   ;;  %s1738_s17 = smov 0  }
  0x18   :  { %s1740_s18 = smov 0   ;;  %s1742_s19 = smov 0  }
  0x19   :  { %s1744_s20 = smov 0  }
  0x1a LB: > { %s2313_s30 = sld [smem:[#allocation17_spill]]  ;;  %2315 = sst [smem:[#allocation18_spill]] %s1611_s9  ;;  %s1655_s20 = sphi %s1744_s20, %s30_s20   ;;  %s1651_s19 = sphi %s1742_s19, %s2386_s19   ;;  %s1647_s18 = sphi %s1740_s18, %s2385_s18   ;;  %s1643_s17 = sphi %s1738_s17, %s2384_s17   ;;  %s1639_s16 = sphi %s1736_s16, %s2383_s16   ;;  %s1635_s15 = sphi %s1734_s15, %s2382_s15   ;;  %s1631_s14 = sphi %s1732_s14, %s2381_s14   ;;  %s1627_s13 = sphi %s1730_s13, %s2394_s13   ;;  %s1623_s12 = sphi %s1728_s12, %s2393_s12   ;;  %s1619_s11 = sphi %s1726_s11, %s2392_s11   ;;  %s1615_s10 = sphi %s1724_s10, %s2391_s10   ;;  %s1611_s9 = sphi %s1722_s9, %s2390_s9   ;;  %s1603_s29 = sphi %s1718_s29, %s2388_s29   ;;  %s1599_s28 = sphi %s1716_s28, %s2387_s28   ;;  %s1595_s27 = sphi %s1714_s27, %s2376_s27  }
  0x1b   : > { %2314 = sst [smem:[#allocation17_spill]] %s1599_s28  ;;  %s1795_s21 = sadd.s32 4294967295, %s1655_s20  }
  0x1c   : > { %2316 = sst [smem:[#allocation19_spill]] %s1631_s14  ;;  %s42_s22 = sadd.s32 1, %s1643_s17 }
  0x1d   : > { %2317 = sst [smem:[#allocation20_spill]] %s1635_s15  ;;  %p43_p0 = scmp.ge.s32.totalorder %s42_s22, 2 }
  0x1e   : > { %2318 = sst [smem:[#allocation21_spill]] %s1639_s16  ;;  %s45_s23 = sadd.s32 1, %s1647_s18 }
  0x1f   : > { %2319 = sst [smem:[#allocation22_spill]] %s1643_s17  ;;  %s49_s24 = sadd.s32 1, %s1651_s19 }
  0x20   : > { %2320 = sst [smem:[#allocation23_spill]] %s1647_s18  ;;  %p2293_p1 = scmp.eq.s32.totalorder %s1655_s20, 0 }
  0x21   : > { %2321 = sst [smem:[#allocation24_spill]] %s1651_s19  ;;  %s2396_s22 = smov (%p43_p0, %s42_s22), 0 }
  0x22   : > { %2322 = sst [smem:[#allocation25_spill]] %s2396_s22  ;;  %s2398_s23 = smov (!%p43_p0, %s45_s23), %s1647_s18 }
  0x23   : > { %p2291_p2 = scmp.eq.s32.totalorder %s1795_s21, 0  ;;  %s84_s25 = ssub.s32 %s1643_s17, %s2396_s22 }
  0x24   : > { %p47_p3 = scmp.ge.s32.totalorder %s2398_s23, 2  ;;  %s88_s26 = sadd.s32 1, %s1615_s10 }
  0x25   : > { %p95_p4 = scmp.ne.s32.totalorder %s1615_s10, %s1611_s9  ;;  %p101_p5 = scmp.ne.s32.totalorder %s1611_s9, %s2313_s30 }
  0x26   : > { %s2400_s23 = smov (%p47_p3, %s2398_s23), 0  ;;  %s2402_s24 = smov (!%p47_p3, %s49_s24), %s1651_s19 }
  0x27   : > { %2323 = sst [smem:[#allocation26_spill]] %s2400_s23  ;;  %s54_s8 = ssub.s32 %s1647_s18, %s2400_s23 }
  0x28   : > { %p1819_p6 = por %p95_p4, %p2293_p1  ;;  %p51_p7 = scmp.ge.s32.totalorder %s2402_s24, 2 }
  0x29   : > { %p1825_p8 = por %p101_p5, %p2291_p2  ;;  %p112_p9 = scmp.eq.s32.totalorder %s84_s25, 0 }
  0x2a   : > { %s114_s30 = sadd.s32 1, %s1603_s29  ;;  %s2404_s24 = smov (%p51_p7, %s2402_s24), 0 }
  0x2b   : > { %s2325_s22 = scalar_select %p1825_p8, 1, 0 }
  0x2c   : > { %2327 = sst [smem:[#allocation28_spill]] %s2404_s24  ;;  %s53_s15 = ssub.s32 %s1651_s19, %s2404_s24 }
  0x2d   : > { %2326 = sst [smem:[#allocation27_spill]] %s2325_s22  ;;  %p121_p10 = scmp.ne.s32.totalorder %s1603_s29, %s1599_s28 }
  0x2e   : > { %s1833_s23 = scalar_select %p112_p9, %s1603_s29, %s114_s30  }
  0x2f   : > { %s1839_s7 = sor.u32 %s54_s8, %s53_s15  ;;  %p127_p11 = scmp.ne.s32.totalorder %s1599_s28, %s1595_s27 }
  0x30   : > { %2328 = sst [smem:[#allocation29_spill]] %s1833_s23  ;;  %s85_s5 = sor.u32 %s84_s25, %s1839_s7 }
  0x31   : > { %p86_p13 = scmp.eq.s32.totalorder %s85_s5, 0  ;;  %p1847_p0 = por %p121_p10, %p2293_p1 }
  0x32   : > { %p1853_p3 = por %p127_p11, %p2291_p2  ;;  %p2292_p4 = scmp.lt.s32.totalorder %s1655_s20, 8 }
  0x33   : > { %s1858_s24 = scalar_select %p86_p13, %s1615_s10, %s88_s26  }
  0x34   : > { %s2330_s30 = scalar_select %p1853_p3, 1, 0 }
  0x35   : > { %2332 = sst [smem:[#allocation31_spill]] %s1858_s24  ;;  %s1070_s8 = sshll.u32 %s1647_s18, 1 }
  0x36   : > { %2331 = sst [smem:[#allocation30_spill]] %s2330_s30  ;;  %s1071_s27 = sshll.u32 %s1651_s19, 2 }
  0x37   : > { %s330_s5 = sand.u32 1, %s1655_s20   ;;  %s317_s15 = sadd.s32 %s1071_s27, %s1070_s8 }
  0x38   : > { %s1072_s25 = sshll.u32 %s317_s15, 6  ;;  %s332_s23 = sand.u32 1, %s1615_s10  }
  0x39   : > { %s2333_s0 = sld [smem:[#allocation33_spill]]  ;;  %s1073_s26 = sshll.u32 %s332_s23, 1 }
  0x3a   : > { %s339_s24 = sadd.s32 %s1643_s17, %s1070_s8  ;;  %s334_s22 = scalar_lea.vmem [#allocation6], %s1073_s26 }
  0x3b   : > { %s341_s30 = sadd.s32 %s1071_s27, %s339_s24  ;;  %s345_s9 = sshll.u32 %s334_s22, 4  ;;  %s1871_s9 = int_to_ptr.vmem [resolvable:$true] %s345_s9 }
  0x3c   : > { %s1076_s18 = sshll.u32 %s341_s30, 5  ;;  %s2334_s1 = sld [smem:[#allocation34_spill]] }
  0x3d   : > { %p1882_p5 = pnand %p2292_p4, %p1819_p6  ;;  %p1890_p7 = pnand %p2292_p4, %p1847_p0 }
  0x3e   : > { %s1896_s6 = scalar_lea.sflag [#allocation7], %s330_s5 }
  0x3f   : > { %s1868_s28 = scalar_lea.hbm %s2333_s0, %s1072_s25  ;;  %p1363_p13 = pneg %p1882_p5 }
  0x42   : > { %s1876_s2 = scalar_lea.hbm %s2334_s1, %s1076_s18  ;;  %s1366_s19 = scalar_lea.hbm %s2334_s1, 256 }
  0x43   : > { %s1361_s16 = scalar_lea.hbm %s1876_s2, 32  ;;  %p1367_p0 = scmp.lt.u32.totalorder %s1876_s2, %s2334_s1 }
  0x44   : > { %p1362_p11 = scmp.ne.s32.totalorder %s1876_s2, %s1361_s16  ;;  %p1368_p4 = scmp.lt.u32.totalorder %s1366_s19, %s1361_s16 }
  0x45   : > { %p1370_p12 = scmp.lt.u32.totalorder %s1361_s16, %s1876_s2 }
  0x46   : > { %p1364_p6 = pnand %p1363_p13, %p1362_p11  ;;  %p1369_p1 = por %p1368_p4, %p1367_p0 }
  0x48   : > { %p1365_p2 = pneg %p1364_p6  ;;  %p1371_p9 = por %p1370_p12, %p1369_p1 }
  0x4a   : > { %p1372_p10 = pnand %p1371_p9, %p1365_p2 }
  0x4c   : > { %1375 = shalt.err (!%p1372_p10)
}
  0x4d   : > { %s1376_s24 = scalar_lea.vmem %s1871_s9, 32  ;;  %s1657_s30 = smov [#allocation6]  }
  0x4e   : > { %p1377_p11 = scmp.ne.s32.totalorder %s1871_s9, %s1376_s24  ;;  %s1381_s8 = sshll.u32 %s1657_s30, 4  ;;  %s1382_s8 = int_to_ptr.vmem [resolvable:$false] %s1381_s8 }
  0x4f   : > { %s1383_s27 = scalar_lea.vmem %s1382_s8, 64  ;;  %p1384_p8 = scmp.lt.s32.totalorder %s1871_s9, %s1382_s8 }
  0x50   : > { %p1379_p6 = pnand %p1377_p11, %p1363_p13  ;;  %p1385_p4 = scmp.lt.s32.totalorder %s1383_s27, %s1376_s24 }
  0x52   : > { %p1380_p3 = pneg %p1379_p6  ;;  %p1386_p0 = por %p1385_p4, %p1384_p8 }
  0x54   : > { %p1387_p1 = pnand %p1386_p0, %p1380_p3 }
  0x56   : > { %1390 = shalt.err (!%p1387_p1)
}
  0x57   : > { %1192 = dma.hbm_to_vmem [thread:$0]  (!%p1882_p5), %s1876_s2, 32, %s1871_s9, %s1896_s6  }
  0x58   : > { %p2337_p2 = scmp.lt.s32.totalorder %s1655_s20, 9  ;;  %p2338_p8 = scmp.ge.s32.totalorder %s1655_s20, 1 }
  0x59   : > { %s1066_s15 = sadd.s32 4294967294, %s1655_s20   ;;  %s58_s25 = sadd.s32 1, %s1627_s13 }
  0x5a   : > { %p1928_p12 = pnand %p2338_p8, %p2337_p2  ;;  %p2340_p3 = scmp.eq.s32.totalorder %s1839_s7, 0 }
  0x5b   : > { %p65_p9 = scmp.ne.s32.totalorder %s1627_s13, %s1623_s12  ;;  %p71_p10 = scmp.ne.s32.totalorder %s1623_s12, %s1619_s11 }
  0x5c   : > { %s2339_s5 = scalar_select %p1928_p12, 1, 0 }
  0x5d   : > { %s1937_s26 = scalar_select %p2340_p3, %s1627_s13, %s58_s25  }
  0x5e   : > { %p278_p13 = scmp.eq.s32.totalorder %s1795_s21, 7  ;;  %p284_p11 = scmp.eq.s32.totalorder %s1066_s15, 7 }
  0x5f   : > { %2341 = sst [smem:[#allocation32_spill]] %s1937_s26  ;;  %p2342_p6 = scmp.eq.s32.totalorder %s1655_s20, 0 }
  0x60   : > { %p2343_p5 = scmp.eq.s32.totalorder %s1795_s21, 0  ;;  %p1952_p1 = por %p278_p13, %p65_p9 }
  0x61   : > { %p67_p4 = por %p2342_p6, %p65_p9  ;;  %p1956_p2 = por %p284_p11, %p71_p10 }
  0x62   : > { %p1948_p0 = por %p2343_p5, %p71_p10  ;;  %s307_s3 = sand.u32 1, %s1627_s13  }
  0x63   : > { %s2345_s9 = scalar_select %p1952_p1, 1, 0 }
  0x64   : > { %s2344_s2 = scalar_select %p1948_p0, 1, 0 }
  0x65   : > { %s2346_s7 = scalar_select %p1956_p2, 1, 0 }
  0x66   : > { %p2347_p8 = scmp.lt.s32.totalorder %s1655_s20, 8  ;;  %s1069_s4 = sshll.u32 %s307_s3, 3 }
  0x67   : > { %s311_s18 = scalar_lea.vmem [#allocation3], %s1069_s4  ;;  %s1969_s22 = scalar_lea.sflag [#allocation4], %s307_s3 }
  0x68   : > { %p1963_p3 = pnand %p2347_p8, %p67_p4  ;;  %s320_s19 = sshll.u32 %s311_s18, 4  ;;  %s1967_s19 = int_to_ptr.vmem [resolvable:$true] %s320_s19 }
  0x69   : > { %s1391_s23 = scalar_lea.hbm %s1868_s28, 128  ;;  %s1396_s8 = scalar_lea.hbm %s2333_s0, 512 }
  0x6a   : > { %p1392_p9 = scmp.ne.s32.totalorder %s1868_s28, %s1391_s23  ;;  %p1393_p10 = pneg %p1963_p3 }
  0x6b   : > { %p1397_p6 = scmp.lt.u32.totalorder %s1868_s28, %s2333_s0  ;;  %p1398_p4 = scmp.lt.u32.totalorder %s1396_s8, %s1391_s23 }
  0x6c   : > { %p1394_p13 = pnand %p1393_p10, %p1392_p9  ;;  %p1400_p8 = scmp.lt.u32.totalorder %s1391_s23, %s1868_s28 }
  0x6d   : > { %p1399_p5 = por %p1398_p4, %p1397_p6 }
  0x6e   : > { %p1395_p11 = pneg %p1394_p13 }
  0x6f   : > { %p1401_p2 = por %p1400_p8, %p1399_p5 }
  0x71   : > { %p1402_p1 = pnand %p1401_p2, %p1395_p11 }
  0x73   : > { %1405 = shalt.err (!%p1402_p1)
}
  0x74   : > { %s1406_s25 = scalar_lea.vmem %s1967_s19, 128  ;;  %s1658_s3 = smov [#allocation3]  }
  0x75   : > { %p1407_p9 = scmp.ne.s32.totalorder %s1967_s19, %s1406_s25  ;;  %s1411_s4 = sshll.u32 %s1658_s3, 4  ;;  %s1412_s4 = int_to_ptr.vmem [resolvable:$false] %s1411_s4 }
  0x76   : > { %s1413_s18 = scalar_lea.vmem %s1412_s4, 256  ;;  %p1414_p12 = scmp.lt.s32.totalorder %s1967_s19, %s1412_s4 }
  0x77   : > { %p1409_p13 = pnand %p1407_p9, %p1393_p10  ;;  %p1415_p6 = scmp.lt.s32.totalorder %s1413_s18, %s1406_s25 }
  0x79   : > { %p1410_p0 = pneg %p1409_p13  ;;  %p1416_p4 = por %p1415_p6, %p1414_p12 }
  0x7b   : > { %p1417_p5 = pnand %p1416_p4, %p1410_p0 }
  0x7d   : > { %1420 = shalt.err (!%p1417_p5)
}
  0x7e   : > { %s1659_s23 = smov 64   ;;  %s1660_s24 = smov 4  }
  0x7f   : > { %1189 = dma.hbm_to_vmem [thread:$0]  (!%p1963_p3), %s1868_s28, 128, %s1967_s19, %s1969_s22, %s1659_s23, %s1659_s23, %s1660_s24  }
  0x80   : > { %s2298_s30 = sand.u32 1, %s1603_s29   ;;  %s1078_s8 = sshll.u32 %s1643_s17, 6 }
  0x81   : > { %s2004_s27 = sshll.u32 %s2298_s30, 6  ;;  %s2349_s3 = sld [smem:[#allocation35_spill]] }
  0x82   : > { %s356_s16 = scalar_lea.vmem [#allocation8], %s2004_s27  ;;  %p1423_p0 = pneg %p1890_p7 }
  0x83   : > { %s362_s18 = sshll.u32 %s356_s16, 4  ;;  %s2012_s18 = int_to_ptr.vmem [resolvable:$true] %s362_s18 }
  0x87   : > { %s2009_s4 = scalar_lea.hbm %s2349_s3, %s1078_s8  ;;  %s1426_s8 = scalar_lea.hbm %s2349_s3, 2048 }
  0x88   : > { %s1421_s28 = scalar_lea.hbm %s2009_s4, 1024  ;;  %p1427_p3 = scmp.lt.u32.totalorder %s2009_s4, %s2349_s3 }
  0x89   : > { %p1422_p12 = scmp.ne.s32.totalorder %s2009_s4, %s1421_s28  ;;  %p1428_p10 = scmp.lt.u32.totalorder %s1426_s8, %s1421_s28 }
  0x8a   : > { %p1430_p8 = scmp.lt.u32.totalorder %s1421_s28, %s2009_s4 }
  0x8b   : > { %p1424_p1 = pnand %p1423_p0, %p1422_p12  ;;  %p1429_p11 = por %p1428_p10, %p1427_p3 }
  0x8d   : > { %p1425_p2 = pneg %p1424_p1  ;;  %p1431_p9 = por %p1430_p8, %p1429_p11 }
  0x8f   : > { %p1432_p13 = pnand %p1431_p9, %p1425_p2 }
  0x91   : > { %1435 = shalt.err (!%p1432_p13)
}
  0x92   : > { %s1436_s16 = scalar_lea.vmem %s2012_s18, 1024  ;;  %s1661_s19 = smov [#allocation8]  }
  0x93   : > { %p1437_p6 = scmp.ne.s32.totalorder %s2012_s18, %s1436_s16  ;;  %s1441_s22 = sshll.u32 %s1661_s19, 4  ;;  %s1442_s22 = int_to_ptr.vmem [resolvable:$false] %s1441_s22 }
  0x94   : > { %s1443_s15 = scalar_lea.vmem %s1442_s22, 2048  ;;  %p1444_p12 = scmp.lt.s32.totalorder %s2012_s18, %s1442_s22 }
  0x95   : > { %p1439_p4 = pnand %p1437_p6, %p1423_p0  ;;  %p1445_p1 = scmp.lt.s32.totalorder %s1443_s15, %s1436_s16 }
  0x97   : > { %p1440_p5 = pneg %p1439_p4  ;;  %p1446_p3 = por %p1445_p1, %p1444_p12 }
  0x99   : > { %p1447_p10 = pnand %p1446_p3, %p1440_p5 }
  0x9b   : > { %1450 = shalt.err (!%p1447_p10)
}
  0x9c   : > { %s1662_s28 = smov 128   ;;  %s1117_s8 = sshll.u32 %s1643_s17, 10 }
  0x9d   : > { %1195 = dma.hbm_to_vmem [thread:$0]  (!%p1890_p7), %s2009_s4, 1024, %s2012_s18, %s1896_s6, %s1662_s28, %s1659_s23, %s1660_s24  }
  0x9e   : > { %s395_s25 = scalar_lea.vmem [#allocation9], %s2004_s27  ;;  %s2350_s15 = sld [smem:[#allocation39_spill]] }
  0x9f   : > { %s402_s19 = sshll.u32 %s395_s25, 4  ;;  %s2352_s1 = sand.u32 1, %s1603_s29   ;;  %s2049_s19 = int_to_ptr.vmem [resolvable:$true] %s402_s19 }
  0xa0   : > { %s2053_s3 = scalar_lea.sflag [#allocation10], %s2352_s1 }
  0xa4   : > { %s2351_s30 = smov %s2350_s15  ;;  %s2047_s0 = scalar_lea.hbm %s2350_s15, %s1117_s8 }
  0xa5   : > { %s1451_s26 = scalar_lea.hbm %s2047_s0, 1024  ;;  %s1456_s4 = scalar_lea.hbm %s2351_s30, 2048 }
  0xa6   : > { %p1452_p2 = scmp.ne.s32.totalorder %s2047_s0, %s1451_s26  ;;  %p1457_p9 = scmp.lt.u32.totalorder %s2047_s0, %s2351_s30 }
  0xa7   : > { %p1458_p13 = scmp.lt.u32.totalorder %s1456_s4, %s1451_s26  ;;  %p1460_p4 = scmp.lt.u32.totalorder %s1451_s26, %s2047_s0 }
  0xa8   : > { %p1454_p11 = pnand %p1452_p2, %p1423_p0 }
  0xa9   : > { %p1459_p6 = por %p1458_p13, %p1457_p9 }
  0xaa   : > { %p1455_p8 = pneg %p1454_p11 }
  0xab   : > { %p1461_p5 = por %p1460_p4, %p1459_p6 }
  0xad   : > { %p1462_p12 = pnand %p1461_p5, %p1455_p8 }
  0xaf   : > { %1465 = shalt.err (!%p1462_p12)
}
  0xb0   : > { %s1466_s1 = scalar_lea.vmem %s2049_s19, 1024  ;;  %s1663_s8 = smov [#allocation9]  }
  0xb1   : > { %p1467_p1 = scmp.ne.s32.totalorder %s2049_s19, %s1466_s1  ;;  %s1471_s25 = sshll.u32 %s1663_s8, 4  ;;  %s1472_s25 = int_to_ptr.vmem [resolvable:$false] %s1471_s25 }
  0xb2   : > { %s1473_s16 = scalar_lea.vmem %s1472_s25, 2048  ;;  %p1474_p2 = scmp.lt.s32.totalorder %s2049_s19, %s1472_s25 }
  0xb3   : > { %p1469_p3 = pnand %p1467_p1, %p1423_p0  ;;  %p1475_p11 = scmp.lt.s32.totalorder %s1473_s16, %s1466_s1 }
  0xb5   : > { %p1470_p10 = pneg %p1469_p3  ;;  %p1476_p9 = por %p1475_p11, %p1474_p2 }
  0xb7   : > { %p1477_p13 = pnand %p1476_p9, %p1470_p10 }
  0xb9   : > { %1480 = shalt.err (!%p1477_p13)
}
  0xba   : > { %1198 = dma.hbm_to_vmem [thread:$0]  (!%p1890_p7), %s2047_s0, 1024, %s2049_s19, %s2053_s3, %s1659_s23, %s1659_s23, %s1660_s24  }
  0xbb   : > { %p2353_p0 = scmp.ne.s32.totalorder %s2339_s5, 0 }
  0xbc   : > { %s2085_s26 = sand.u32 (!%p2353_p0), 1, %s1623_s12   ;;  %p2354_p8 = scmp.ne.s32.totalorder (!%p2353_p0), %s2344_s2, 0 }
  0xbd   : > { %414 = sbr.rel (%p2353_p0) target bundleno = 777 (0x309), region = 52  ;;  %s1083_s22 = sshll.u32 (!%p2353_p0), %s2085_s26, 3 }
  0xbe   : > { %s417_s15 = scalar_lea.sflag (!%p2353_p0), [#allocation4], %s2085_s26  ;;  %s2089_s6 = scalar_lea.vmem (!%p2353_p0), [#allocation3], %s1083_s22 }
  0xc4   : > { %1574 = dma.done.wait (%p2354_p8), %s417_s15, 128  }
  0xc5   : > { %1576 = vsyncadd (%p2354_p8), %s417_s15, 4294967168  ;;  %s2355_s0 = sld [smem:[#allocation18_spill]]  ;;  %s2356_s14 = sld [smem:[#allocation27_spill]] }
  0xc6   : > { %s425_s5 = sand.u32 1, %s1795_s21  }
  0xc7   : > { %s426_s3 = scalar_lea.sflag [#allocation7], %s425_s5 }
  0xcb   : > { %s427_s23 = sand.u32 1, %s2355_s0   ;;  %p2357_p7 = scmp.ne.s32.totalorder %s2356_s14, 0 }
  0xcc   : > { %s2097_s24 = sshll.u32 %s427_s23, 1 }
  0xcd   : > { %1578 = dma.done.wait (%p2357_p7), %s426_s3, 32  }
  0xce   : > { %1580 = vsyncadd (%p2357_p7), %s426_s3, 4294967264  ;;  %s2358_s27 = sld [smem:[#allocation17_spill]]  ;;  %s2359_s4 = sld [smem:[#allocation30_spill]] }
  0xd4   : > { %s436_s18 = sand.u32 1, %s2358_s27   ;;  %p2360_p6 = scmp.ne.s32.totalorder %s2359_s4, 0 }
  0xd5   : > { %s1085_s2 = sshll.u32 %s436_s18, 6 }
  0xd6   : > { %s2105_s28 = scalar_lea.vmem [#allocation8], %s1085_s2 }
  0xd7   : > { %1582 = dma.done.wait (%p2360_p6), %s426_s3, 1024  }
  0xd8   : > { %1584 = vsyncadd (%p2360_p6), %s426_s3, 4294966272  ;;  %s444_s21 = scalar_lea.sflag [#allocation10], %s436_s18  ;;  %s2111_s1 = scalar_lea.vmem [#allocation9], %s1085_s2 }
  0xd9   : > { %1586 = dma.done.wait (%p2360_p6), %s444_s21, 1024  }
  0xda   : > { %1588 = vsyncadd (%p2360_p6), %s444_s21, 4294966272  ;;  %s2361_s8 = sld [smem:[#allocation19_spill]]  ;;  %s1087_s25 = sshll.u32 %s2085_s26, 4 }
  0xdb   : > { %s2362_s0 = sld [smem:[#allocation36_spill]]  ;;  %s2363_s27 = sld [smem:[#allocation37_spill]] }
  0xdc   : > { %s2364_s21 = sld [smem:[#allocation38_spill]]  ;;  %s2136_s30 = scalar_lea.vmem [#allocation11], %s1087_s25 }
  0xe0   : > { %p506_p4 = scmp.lt.s32.totalorder %s2361_s8, 1  ;;  %p1089_p5 = scmp.ne.s32.totalorder %s2361_s8, 0 }
  0xe1   : > { %s2365_s15 = sld [smem:[#allocation40_spill]] (!%p1089_p5) }
  0xe2   : > { %s2120_s16 = scalar_select %p506_p4, %s2361_s8, 1 }
  0xe3   : > { %522 = sbr.rel (%p1089_p5) target bundleno = 234 (0xea), region = 72 }
  0xe4   : > { %s508_s14 = scalar_lea.vmem %s2362_s0, %s2120_s16  ;;  %s1088_s5 = sshll.u32 %s2120_s16, 2 }
  0xe5   : > { %s2130_s4 = scalar_lea.vmem %s2363_s27, %s1088_s5  ;;  %s515_s19 = scalar_lea.vmem %s2364_s21, %s2120_s16 }
  0xe7   : > { %v1090_v0 = vld [vmem:[%s2365_s15] ss:$0 sm:$0xff] (!%p1089_p5) }
  0xe8   : > { %530 = vst [vmem:[#allocation2] sm:$0xff] (!%p1089_p5), %v1090_v0  ;;  %531 = vst [vmem:[#allocation2 + $0x8] sm:$0xff] (!%p1089_p5), %v1090_v0 }
  0xea PF: > { %v1340_v1 = vld [vmem:[%s2105_s28] sm:$0xff]   ;;  %v1664_v2 = vmov 0.0   ;;  %v1341_v3 = vld [vmem:[%s2105_s28 + $0x8] sm:$0xff]   ;;  %vm1665_vm0 = vmmov 0   ;;  %v1342_v4 = vld [vmem:[%s2105_s28 + $0x10] sm:$0xff]   ;;  %v653_v19 = vlaneseq  ;;  %s2367_s8 = scalar_lea.vmem [#allocation6], %s2097_s24 }
  0xeb   : > { %1136 = vmatprep.subr.bf16.mxu0 %v1664_v2  ;;  %1156 = vmatprep.subr.bf16.mxu1 %v1664_v2  ;;  %v1343_v5 = vld [vmem:[%s2105_s28 + $0x18] sm:$0xff]   ;;  %v1344_v6 = vld [vmem:[%s2105_s28 + $0x20] sm:$0xff]   ;;  %v1345_v7 = vld [vmem:[%s2105_s28 + $0x28] sm:$0xff]  }
  0xec   : > { %1137 = vmatpush3.bf16.msra.mxu0 %v1340_v1  ;;  %1152 = vmatprep.mubr.msk.bf16.mxu0 %vm1665_vm0, %v1664_v2  ;;  %v1346_v8 = vld [vmem:[%s2105_s28 + $0x30] sm:$0xff]   ;;  %v1347_v9 = vld [vmem:[%s2105_s28 + $0x38] sm:$0xff]   ;;  %v1349_v11 = vld [vmem:[%s2111_s1] sm:$0xff]   ;;  %v654_v20 = vshrl.u32 %v653_v19, 7 }
  0xed   : > { %1138 = vmatprep.subr.bf16.mxu0 %v1664_v2  ;;  %1172 = vmatprep.mubr.msk.bf16.mxu1 %vm1665_vm0, %v1664_v2  ;;  %v1348_v10 = vld [vmem:[%s2089_s6] sm:$0xff]   ;;  %v1353_v15 = vld [vmem:[%s2111_s1 + $0x20] sm:$0xff]   ;;  %v682_v21 = vld [vmem:[%s2130_s4] sm:$0x7] }
  0xee   : > { %1157 = vmatpush3.bf16.msra.mxu1 %v1349_v11  ;;  %v1350_v12 = vld [vmem:[%s2111_s1 + $0x8] sm:$0xff]   ;;  %v1351_v13 = vld [vmem:[%s2111_s1 + $0x10] sm:$0xff]   ;;  %v1352_v14 = vld [vmem:[%s2111_s1 + $0x18] sm:$0xff]   ;;  %v678_v23 = vsub.s32 1, %v654_v20  ;;  %v683_v24 = vadd.f32 1.0, %v682_v21  ;;  %v665_v26 = vsub.s32 0, %v654_v20 }
  0xef   : > { %1158 = vmatprep.subr.bf16.mxu1 %v1664_v2  ;;  %v1354_v16 = vld [vmem:[%s2111_s1 + $0x28] sm:$0xff]   ;;  %v1355_v17 = vld [vmem:[%s2111_s1 + $0x30] sm:$0xff]   ;;  %v1356_v18 = vld [vmem:[%s2111_s1 + $0x38] sm:$0xff]   ;;  %v655_v28 = vadd.s32 8, %v654_v20  ;;  %v700_v29 = vsub.s32 2, %v654_v20  ;;  %vm658_vm1 = vcmp.lt.s32.totalorder %v654_v20, 1 }
  0xf0   : > { %1139 = vmatpush3.bf16.msra.mxu0 %v1341_v3  ;;  %v1091_v22 = vld [vmem:[%s508_s14] ss:$0 sm:$0xff]  ;;  %v687_v33 = vrot.slane %v683_v24, %v678_v23  ;;  %vm671_vm2 = vcmp.lt.s32.totalorder %v654_v20, 7  ;;  %vm661_vm3 = vcmp.eq.s32.totalorder %v654_v20, 0  ;;  %v693_v38 = vrot.slane %v682_v21, %v665_v26  ;;  %v734_v20 = vld [vmem:[#allocation2 + $0x8] sm:$0xff] }
  0xf1   : > { %1140 = vmatprep.subr.bf16.mxu0 %v1664_v2  ;;  %v652_v25 = vld [vmem:[%s2367_s8] sm:$0x3]  ;;  %vm675_vm4 = vcmp.eq.s32.totalorder %v655_v28, 15  ;;  %v701_v39 = vrot.slane %v682_v21, %v700_v29 }
  0xf2   : > { %1159 = vmatpush3.bf16.msra.mxu1 %v1350_v12  ;;  %v679_v32 = vrot.slane %v652_v25, %v678_v23  ;;  %v666_v35 = vrot.slane %v652_v25, %v665_v26  ;;  %v1101_v58 = vld [vmem:[%s515_s19] ss:$0 sm:$0xff]  ;;  %s2369_s19 = sld [smem:[#allocation19_spill]] }
  0xf3   : > { %1160 = vmatprep.subr.bf16.mxu1 %v1664_v2 }
  0xf4   : > { %1141 = vmatpush3.bf16.msra.mxu0 %v1342_v4 }
  0xf5   : > { %1142 = vmatprep.subr.bf16.mxu0 %v1664_v2 }
  0xf6   : > { %1161 = vmatpush3.bf16.msra.mxu1 %v1351_v13 }
  0xf7   : > { %1162 = vmatprep.subr.bf16.mxu1 %v1664_v2 }
  0xf8   : > { %1143 = vmatpush3.bf16.msra.mxu0 %v1343_v5  ;;  %p1110_p12 = scmp.ne.s32.totalorder %s2369_s19, 1 }
  0xf9   : > { %1144 = vmatprep.subr.bf16.mxu0 %v1664_v2 }
  0xfa   : > { %1163 = vmatpush3.bf16.msra.mxu1 %v1352_v14 }
  0xfb   : > { %1164 = vmatprep.subr.bf16.mxu1 %v1664_v2 }
  0xfc   : > { %1145 = vmatpush3.bf16.msra.mxu0 %v1344_v6 }
  0xfd   : > { %1146 = vmatprep.subr.bf16.mxu0 %v1664_v2 }
  0xfe   : > { %1165 = vmatpush3.bf16.msra.mxu1 %v1353_v15 }
  0xff   : > { %1166 = vmatprep.subr.bf16.mxu1 %v1664_v2 }
 0x100   : > { %1147 = vmatpush3.bf16.msra.mxu0 %v1345_v7 }
 0x101   : > { %1148 = vmatprep.subr.bf16.mxu0 %v1664_v2 }
 0x102   : > { %1167 = vmatpush3.bf16.msra.mxu1 %v1354_v16 }
 0x103   : > { %1168 = vmatprep.subr.bf16.mxu1 %v1664_v2 }
 0x104   : > { %1149 = vmatpush3.bf16.msra.mxu0 %v1346_v8 }
 0x105   : > { %1150 = vmatprep.subr.bf16.mxu0 %v1664_v2 }
 0x106   : > { %1169 = vmatpush3.bf16.msra.mxu1 %v1355_v17 }
 0x107   : > { %1170 = vmatprep.subr.bf16.mxu1 %v1664_v2 }
 0x108   : > { %1151 = vmatpush3.bf16.msra.mxu0 %v1347_v9 }
 0x10a   : > { %1171 = vmatpush3.bf16.msra.mxu1 %v1356_v18  ;;  %v733_v18 = vld [vmem:[#allocation2] sm:$0xff] }
 0x10b   : > { %1153 = vmatmul.mubr.bf16.vlgmr.msra.gmra.mrb[0].mxu0 %v1348_v10 }
 0x1de   : > { %v645_v27 = vpop.f32.mrb[0].mxu0 }
 0x1df   : > { %v646_v30 = vadd.f32 %v1091_v22, %v645_v27  ;;  %v1154_v31 = vpop.f32.mrb[1].mxu0 }
 0x1e0   : > { %v648_v34 = vpop.f32.mrb[2].mxu0 }
 0x1e1   : > { %v649_v36 = vadd.f32 %v1091_v22, %v648_v34  ;;  %v1155_v37 = vpop.f32.mrb[3].mxu0  ;;  %v656_v40 = vrot.slane %v646_v30, 7  ;;  %v669_v41 = vrot.slane %v646_v30, 1  ;;  %v688_v52 = vmul.f32 %v687_v33, %v646_v30 }
 0x1e3   : > { %v657_v42 = vrot.slane %v649_v36, 7  ;;  %v670_v43 = vrot.slane %v649_v36, 1  ;;  %v689_v50 = vmul.f32 %v687_v33, %v649_v36 }
 0x1e5   : > { %v659_v44 = vsel %vm658_vm1, %v656_v40, %v657_v42  ;;  %v660_v45 = vsel %vm658_vm1, %v657_v42, %v656_v40  ;;  %v672_v46 = vsel %vm671_vm2, %v669_v41, %v670_v43  ;;  %v673_v47 = vsel %vm671_vm2, %v670_v43, %v669_v41 }
 0x1e6   : > { %v667_v48 = vsel %vm661_vm3, %v666_v35, %v660_v45  ;;  %v681_v49 = vsel %vm675_vm4, %v679_v32, %v673_v47  ;;  %v695_v51 = vmul.f32 %v693_v38, %v659_v44  ;;  %v702_v57 = vmul.f32 %v701_v39, %v672_v46 }
 0x1e7   : > { %v694_v53 = vmul.f32 %v693_v38, %v667_v48  ;;  %v703_v54 = vmul.f32 %v701_v39, %v681_v49 }
 0x1e8   : > { %v697_v55 = vadd.f32 %v695_v51, %v689_v50 }
 0x1e9   : > { %v696_v56 = vadd.f32 %v694_v53, %v688_v52 }
 0x1ea   : > { %v705_v59 = vadd.f32 %v703_v54, %v697_v55 }
 0x1eb   : > { %v704_v60 = vadd.f32 %v702_v57, %v696_v56 }
 0x1ec   : > { %v714_v61 = vadd.f32 %v1101_v58, %v705_v59 }
 0x1ed   : > { %v713_v62 = vadd.f32 %v1101_v58, %v704_v60 }
 0x1ee   : > { %v718_v63 = vmul.f32 0.044715, %v714_v61  ;;  %v716_v11 = vmul.f32 0.5, %v714_v61 }
 0x1ef   : > { %v717_v0 = vmul.f32 0.044715, %v713_v62  ;;  %v715_v13 = vmul.f32 0.5, %v713_v62 }
 0x1f0   : > { %v720_v1 = vmul.f32 %v718_v63, %v714_v61 }
 0x1f1   : > { %v719_v2 = vmul.f32 %v717_v0, %v713_v62 }
 0x1f2   : > { %v722_v3 = vmul.f32 %v720_v1, %v714_v61 }
 0x1f3   : > { %v721_v4 = vmul.f32 %v719_v2, %v713_v62 }
 0x1f4   : > { %v724_v5 = vadd.f32 %v722_v3, %v714_v61 }
 0x1f5   : > { %v723_v6 = vadd.f32 %v721_v4, %v713_v62 }
 0x1f6   : > { %v726_v7 = vmul.f32 0.7978846, %v724_v5 }
 0x1f7   : > { %v725_v8 = vmul.f32 0.7978846, %v723_v6 }
 0x1f8   : > { %1357 = vtanh.f32 %v726_v7 }
 0x1f9   : > { %1359 = vtanh.f32 %v725_v8 }
 0x202   : > { %v1358_v9 = vpop.eup %1357 }
 0x203   : > { %v1360_v10 = vpop.eup %1359  ;;  %v730_v12 = vadd.f32 1.0, %v1358_v9 }
 0x204   : > { %v729_v14 = vadd.f32 1.0, %v1360_v10 }
 0x205   : > { %v732_v15 = vmul.f32 %v730_v12, %v716_v11 }
 0x206   : > { %v731_v16 = vmul.f32 %v729_v14, %v715_v13 }
 0x208   : > { %v735_v17 = vpack.c.bf16 %v732_v15, %v731_v16 }
 0x20a   : > { %1173 = vmatmul.mubr.bf16.vlgmr.msra.gmra.mrb[0].mxu1 %v735_v17 }
 0x2dc   : > { %848 = sbr.rel (%p1110_p12) target bundleno = 747 (0x2eb), region = 76 }
 0x2dd   : > { %v834_v19 = vpop.f32.mrb[0].mxu1 }
 0x2de   : > { %v841_v21 = vadd.f32 %v834_v19, %v733_v18  ;;  %v1174_v22 = vpop.f32.mrb[1].mxu1 }
 0x2df   : > { %v837_v23 = vpop.f32.mrb[2].mxu1 }
 0x2e0   : > { %843 = vst [vmem:[#allocation2] sm:$0xff] %v841_v21  ;;  %v842_v24 = vadd.f32 %v837_v23, %v734_v20  ;;  %v1175_v25 = vpop.f32.mrb[3].mxu1 }
 0x2e2   : > { %844 = vst [vmem:[#allocation2 + $0x8] sm:$0xff] %v842_v24 }
 0x2e7   : > { %v849_v26 = vld [vmem:[#allocation2] sm:$0xff] }
 0x2e8   : > { %851 = vst [vmem:[%s2136_s30] sm:$0xff] %v849_v26 }
 0x2e9   : > { %v850_v27 = vld [vmem:[#allocation2 + $0x8] sm:$0xff] }
 0x2ea   : > { %852 = vst [vmem:[%s2136_s30 + $0x8] sm:$0xff] %v850_v27 }
 0x2eb PF: > { %s2370_s16 = sld [smem:[#allocation20_spill]]  ;;  %s2371_s0 = sld [smem:[#allocation21_spill]] }
 0x2ec   : > { %s869_s23 = sshll.u32 %s2136_s30, 4  ;;  %s2372_s2 = sld [smem:[#allocation41_spill]]  ;;  %s2178_s23 = int_to_ptr.vmem [resolvable:$true] %s869_s23 }
 0x2ed   : > { %s854_s22 = scalar_lea.sflag [#allocation5], %s2085_s26  ;;  %s1481_s15 = scalar_lea.vmem %s2178_s23, 256 }
 0x2ee   : > { %p1482_p1 = scmp.ne.s32.totalorder %s2178_s23, %s1481_s15  ;;  %p2373_p3 = scmp.ne.s32.totalorder %s2345_s9, 0 }
 0x2ef   : > { %s1666_s17 = smov [#allocation11]  }
 0x2f0   : > { %p1483_p10 = pnand %p1482_p1, %p2373_p3  ;;  %s1485_s30 = sshll.u32 %s1666_s17, 4  ;;  %s1486_s30 = int_to_ptr.vmem [resolvable:$false] %s1485_s30 }
 0x2f1   : > { %s1112_s14 = sshll.u32 %s2370_s16, 1  ;;  %s1113_s5 = sshll.u32 %s2371_s0, 2 }
 0x2f2   : > { %s866_s3 = sadd.s32 %s1113_s5, %s1112_s14  ;;  %p1484_p2 = pneg %p1483_p10 }
 0x2f3   : > { %s1114_s27 = sshll.u32 %s866_s3, 7  ;;  %s1487_s6 = scalar_lea.vmem %s1486_s30, 512 }
 0x2f4   : > { %s2183_s21 = scalar_lea.hbm %s2372_s2, %s1114_s27  ;;  %p1488_p11 = scmp.lt.s32.totalorder %s2178_s23, %s1486_s30 }
 0x2f5   : > { %p1489_p9 = scmp.lt.s32.totalorder %s1487_s6, %s1481_s15 }
 0x2f7   : > { %p1490_p13 = por %p1489_p9, %p1488_p11 }
 0x2f9   : > { %p1491_p0 = pnand %p1490_p13, %p1484_p2 }
 0x2fb   : > { %1494 = shalt.err (!%p1491_p0)
}
 0x2fc   : > { %s1495_s28 = scalar_lea.hbm %s2183_s21, 256  ;;  %s1499_s1 = scalar_lea.hbm %s2372_s2, 1024 }
 0x2fd   : > { %p1496_p8 = scmp.ne.s32.totalorder %s2183_s21, %s1495_s28  ;;  %p1500_p4 = scmp.lt.u32.totalorder %s2183_s21, %s2372_s2 }
 0x2fe   : > { %p1501_p5 = scmp.lt.u32.totalorder %s1499_s1, %s1495_s28  ;;  %p1503_p1 = scmp.lt.u32.totalorder %s1495_s28, %s2183_s21 }
 0x2ff   : > { %p1497_p7 = pnand %p1496_p8, %p2373_p3 }
 0x300   : > { %p1502_p12 = por %p1501_p5, %p1500_p4 }
 0x301   : > { %p1498_p6 = pneg %p1497_p7 }
 0x302   : > { %p1504_p10 = por %p1503_p1, %p1502_p12 }
 0x304   : > { %p1505_p2 = pnand %p1504_p10, %p1498_p6 }
 0x306   : > { %1508 = shalt.err (!%p1505_p2)
}
 0x307   : > { %s1667_s16 = smov 128   ;;  %s1668_s0 = smov 8  }
 0x308   : > { %1184 = dma.vmem_to_hbm [thread:$0]  (%p2373_p3), %s2178_s23, 256, %s2183_s21, %s854_s22, %s1667_s16, %s1667_s16, %s1668_s0  }
 0x309 PF: > { %p1204_p11 = scmp.ge.s32.totalorder %s1655_s20, 2  ;;  %s884_s14 = sand.u32 1, %s1619_s11  }
 0x30a   : > { %p2374_p9 = scmp.ne.s32.totalorder %s2346_s7, 0  ;;  %s885_s5 = scalar_lea.sflag [#allocation5], %s884_s14 }
 0x30c   : > { %p1200_p13 = pnand %p1204_p11, %p2374_p9 }
 0x30e   : > { %1590 = dma.done.wait (!%p1200_p13), %s885_s5, 256  }
 0x30f   : > { %1592 = vsyncadd (!%p1200_p13), %s885_s5, 4294967040  ;;  %s30_s20 = sadd.s32 1, %s1655_s20   ;;  %s2376_s27 = sld [smem:[#allocation17_spill]] }
 0x310   : > { %p2214_p0 = scmp.ge.s32.totalorder %s30_s20, 10   ;;  %s2377_s9 = sld [smem:[#allocation29_spill]] }
 0x311   : > { %s2378_s30 = sld [smem:[#allocation18_spill]]  ;;  %s2380_s23 = sld [smem:[#allocation32_spill]] }
 0x312   : > { %s2379_s26 = sld [smem:[#allocation31_spill]]  ;;  %s2381_s14 = sld [smem:[#allocation22_spill]] }
 0x313   : > { %s2382_s15 = sld [smem:[#allocation23_spill]]  ;;  %s2383_s16 = sld [smem:[#allocation24_spill]] }
 0x314   : > { %s2384_s17 = sld [smem:[#allocation25_spill]]  ;;  %s2385_s18 = sld [smem:[#allocation26_spill]] }
 0x315   : > { %s2386_s19 = sld [smem:[#allocation28_spill]]  ;;  %s2387_s28 = smov %s1603_s29 }
 0x316   : > { %s2388_s29 = smov %s2377_s9  ;;  %s2390_s9 = smov %s1615_s10 }
 0x317   : > { %2389 = sst [smem:[#allocation17_spill]] %s2378_s30  ;;  %s2392_s11 = smov %s1623_s12 }
 0x318   : > { %s2391_s10 = smov %s2379_s26  ;;  %s2393_s12 = smov %s1627_s13 }
 0x319   : > { %s2394_s13 = smov %s2380_s23  ;;  %29 = sbr.rel (!%p2214_p0) target bundleno = 26 (0x1a), region = 151 }
 0x320   :  { %890 = vsyncpa [#allocation4], 1 }
 0x321   :  { %892 = vsyncpa [#allocation4 + $0x1], 1 }
 0x322   :  { %893 = vsyncpa [#allocation7], 1 }
 0x323   :  { %895 = vsyncpa [#allocation7 + $0x1], 1 }
 0x324   :  { %896 = vsyncpa [#allocation10], 1 }
 0x325   :  { %898 = vsyncpa [#allocation10 + $0x1], 1 }
 0x326   :  { %899 = vsyncpa [#allocation5], 1 }
 0x327   :  { %901 = vsyncpa [#allocation5 + $0x1], 1 }

</bundles_post_ra>
